<compile_context>
chip_gen: v5e
topology: v5e:2x2
jax: 0.10.0
libtpu: 0.0.40
codegen_flags: <defaults>
</compile_context>

<pallas_src>
import jax
import jax.numpy as jnp
from jax.experimental import pallas as pl
from jax.experimental.pallas import tpu as pltpu


def _round_up(a: int, b: int) -> int:
    return ((a + b - 1) // b) * b


def _affine_kernel(x_ref, w_ref, t_ref, o_ref):
    # x_ref: (tile_n, dim_p)   w_ref: (dim_p, dim_p) = A^T   t_ref: (1, dim_p) f32
    acc = jnp.dot(x_ref[...], w_ref[...], preferred_element_type=jnp.float32)
    o_ref[...] = (acc + t_ref[...]).astype(o_ref.dtype)


def affine_operator(embeddings, linear_transformation, translation,
                    *, tile_n=512, weight_dtype=None):
    """embeddings: (..., dim); returns same shape/dtype as embeddings."""
    dim = embeddings.shape[-1]
    orig_shape = embeddings.shape
    out_dtype = embeddings.dtype

    x2d = embeddings.reshape(-1, dim)
    n = x2d.shape[0]

    # --- lane-dense layout: pad feature dim up to a multiple of 128 ---------
    dim_p = _round_up(dim, 128)
    w = linear_transformation.T            # out = x @ A^T; transpose once here
    if dim_p != dim:
        pad = dim_p - dim
        x2d = jnp.pad(x2d, ((0, 0), (0, pad)))
        w = jnp.pad(w, ((0, pad), (0, pad)))
        t = jnp.pad(translation, (0, pad))
    else:
        t = translation
    t2d = t.reshape(1, dim_p).astype(jnp.float32)

    if weight_dtype is not None:           # optional bf16 weight for MXU speed
        w = w.astype(weight_dtype)

    # --- row tiling: big tiles, clamped for tiny inputs ---------------------
    # (32-row granularity keeps sublane alignment for f32/bf16/int8 blocks)
    tile_n = max(32, min(tile_n, _round_up(n, 32)))
    grid_n = pl.cdiv(n, tile_n)            # ragged last block, no row padding

    # --- explicit VMEM budget: 2x x-tile + 2x out-tile + W + t + slack ------
    x_bytes = jnp.dtype(x2d.dtype).itemsize
    o_bytes = jnp.dtype(out_dtype).itemsize
    w_bytes = jnp.dtype(w.dtype).itemsize
    vmem_bytes = (2 * tile_n * dim_p * x_bytes
                  + 2 * tile_n * dim_p * o_bytes
                  + dim_p * dim_p * w_bytes
                  + 8 * dim_p * 4
                  + (4 << 20))
    vmem_bytes = int(min(max(vmem_bytes, 16 << 20), 64 << 20))
    # TODO(synk): for very large dim (resident A > ~48 MiB) add a K-tiled grid
    # axis with an f32 VMEM accumulator instead of keeping A fully resident.

    out = pl.pallas_call(
        _affine_kernel,
        out_shape=jax.ShapeDtypeStruct((n, dim_p), out_dtype),
        grid_spec=pltpu.PrefetchScalarGridSpec(
            num_scalar_prefetch=0,
            grid=(grid_n,),
            in_specs=[
                pl.BlockSpec((tile_n, dim_p), lambda i: (i, 0)),   # X row tile
                pl.BlockSpec((dim_p, dim_p), lambda i: (0, 0)),    # W = A^T (resident)
                pl.BlockSpec((1, dim_p), lambda i: (0, 0)),        # t (resident, f32)
            ],
            out_specs=pl.BlockSpec((tile_n, dim_p), lambda i: (i, 0)),
        ),
        compiler_params=pltpu.CompilerParams(
            dimension_semantics=("parallel",),
            vmem_limit_bytes=vmem_bytes,
        ),
    )(x2d, w, t2d)

    if dim_p != dim:
        out = out[:, :dim]
    return out.reshape(orig_shape)


if __name__ == "__main__":
    key = jax.random.PRNGKey(0)
    k1, k2, k3 = jax.random.split(key, 3)

    batch, seq, dim = 2, 8, 32

    # deterministic example input, shape (..., dim)
    x = jax.random.normal(k1, (batch, seq, dim), dtype=jnp.float32)

    # deterministic parameters (module __init__ uses eye / zeros; perturb
    # slightly so the kernel is exercised non-trivially but deterministically)
    linear_transformation = (
        jnp.eye(dim, dtype=jnp.float32)
        + 0.01 * jax.random.normal(k2, (dim, dim), dtype=jnp.float32)
    )
    translation = 0.1 * jax.random.normal(k3, (dim,), dtype=jnp.float32)

    out = affine_operator(x, linear_transformation, translation)
    out = jax.block_until_ready(out)

    # pure-JAX reference of the PyTorch semantics: x @ A^T + t
    ref = jnp.einsum("...j,ij->...i", x, linear_transformation) + translation
    assert out.shape == x.shape
    assert out.dtype == x.dtype
    assert jnp.allclose(out, ref, atol=1e-5, rtol=1e-5), "mismatch vs reference"

    print("KERNEL_OK")
</pallas_src>

<mosaic_0001>
module attributes {stable_mosaic.version = 11 : i64} {
  func.func @_affine_kernel(%arg0: i32, %arg1: memref<32x128xf32, #tpu.memory_space<vmem>>, %arg2: memref<128x128xf32, #tpu.memory_space<vmem>>, %arg3: memref<1x128xf32, #tpu.memory_space<vmem>>, %arg4: memref<32x128xf32, #tpu.memory_space<vmem>>) attributes {dimension_semantics = [#tpu.dimension_semantics<parallel>], iteration_bounds = array<i64: 1>, scalar_prefetch = 0 : i64, scratch_operands = 0 : i64, tpu.core_type = #tpu.core_type<tc>, window_params = [{transform_indices = @transform_0, window_bounds = array<i64: 32, 128>}, {pipeline_mode = #tpu.pipeline_mode<synchronous>, transform_indices = @transform_1, window_bounds = array<i64: 128, 128>}, {pipeline_mode = #tpu.pipeline_mode<synchronous>, transform_indices = @transform_2, window_bounds = array<i64: 1, 128>}, {transform_indices = @transform_3, window_bounds = array<i64: 32, 128>}]} {
    %c0 = arith.constant 0 : index
    %c0_0 = arith.constant 0 : index
    %0 = vector.load %arg1[%c0, %c0_0] : memref<32x128xf32, #tpu.memory_space<vmem>>, vector<32x128xf32>
    %c0_1 = arith.constant 0 : index
    %c0_2 = arith.constant 0 : index
    %1 = vector.load %arg2[%c0_1, %c0_2] : memref<128x128xf32, #tpu.memory_space<vmem>>, vector<128x128xf32>
    %cst = arith.constant dense<0.000000e+00> : vector<32x128xf32>
    %2 = tpu.matmul %0, %1, %cst {dimension_numbers = #tpu.dot_dimension_numbers<[1], [0], [0], [1], [0, 0, 1, 1], [], []>} : vector<32x128xf32>, vector<128x128xf32>, vector<32x128xf32> -> vector<32x128xf32>
    %c0_3 = arith.constant 0 : index
    %c0_4 = arith.constant 0 : index
    %3 = vector.load %arg3[%c0_3, %c0_4] : memref<1x128xf32, #tpu.memory_space<vmem>>, vector<1x128xf32>
    %4 = vector.broadcast %3 : vector<1x128xf32> to vector<32x128xf32>
    %5 = arith.addf %2, %4 : vector<32x128xf32>
    %c0_5 = arith.constant 0 : index
    %c0_6 = arith.constant 0 : index
    %6 = vector.load %arg4[%c0_5, %c0_6] : memref<32x128xf32, #tpu.memory_space<vmem>>, vector<32x128xf32>
    tpu.vector_store %arg4[%c0_5, %c0_6], %5 {strides = array<i32>} : memref<32x128xf32, #tpu.memory_space<vmem>>, vector<32x128xf32>,
    return
  }
  func.func @transform_0(%arg0: i32) -> (i32, i32) {
    %c0_i32 = arith.constant 0 : i32
    %c0_i32_0 = arith.constant 0 : i32
    return %arg0, %c0_i32 : i32, i32
  }
  func.func @transform_1(%arg0: i32) -> (i32, i32) {
    %c0_i32 = arith.constant 0 : i32
    %c0_i32_0 = arith.constant 0 : i32
    %c0_i32_1 = arith.constant 0 : i32
    return %c0_i32, %c0_i32_0 : i32, i32
  }
  func.func @transform_2(%arg0: i32) -> (i32, i32) {
    %c0_i32 = arith.constant 0 : i32
    %c0_i32_0 = arith.constant 0 : i32
    %c0_i32_1 = arith.constant 0 : i32
    return %c0_i32, %c0_i32_0 : i32, i32
  }
  func.func @transform_3(%arg0: i32) -> (i32, i32) {
    %c0_i32 = arith.constant 0 : i32
    %c0_i32_0 = arith.constant 0 : i32
    return %arg0, %c0_i32 : i32, i32
  }
}

</mosaic_0001>

<bundles_post_ra>
// kernel: tpu_custom_call.1
= control target key start
LH: loop header
LB: loop body
LE: loop exit
PB: predicated region body
PF: predicated region fallthrough
CT: control target
= control target key end

     0   :  { %8 = vsyncpa [#allocation3], 0  ;;  %s302_s0 = inlined_call_operand.hbm [shape: f32[16,128], index: 0, kind: input, shape index: {}]   ;;  %s303_s1 = inlined_call_operand.hbm [shape: f32[128,128], index: 1, kind: input, shape index: {}]   ;;  %s304_s2 = inlined_call_operand.vmem [shape: f32[1,128], index: 2, kind: input, shape index: {}]   ;;  %s305_s3 = inlined_call_operand.hbm [shape: f32[16,128], index: 3, kind: output, shape index: {}]  }
   0x1   :  { %9 = vsyncpa [#allocation6], 0 }
   0x2   :  { %10 = vsyncpa [#allocation4], 0 }
   0x3   :  { %14 = vsyncadd [#allocation3], 256  ;;  %s15_s14 = sshll.u32 %s302_s0, 4  ;;  %s256_s15 = smov [#allocation2]   ;;  %s16_s14 = int_to_ptr.hbm [resolvable:$true] %s15_s14 }
   0x4   :  { %s17_s16 = sshll.u32 %s256_s15, 4  ;;  %s28_s19 = sshll.u32 %s303_s1, 4  ;;  %s18_s16 = int_to_ptr.vmem [resolvable:$true] %s17_s16  ;;  %s29_s19 = int_to_ptr.hbm [resolvable:$true] %s28_s19 }
   0x5   :  { %s257_s20 = smov 128   ;;  %s258_s21 = smov 8  }
   0x6   :  { %23 = dma.hbm_to_vmem [thread:$0]  %s16_s14, 256, %s18_s16, [#allocation3], %s257_s20, %s257_s20, %s258_s21  }
   0x7   :  { %s259_s22 = smov [#allocation5]  }
   0x8   :  { %s30_s23 = sshll.u32 %s259_s22, 4  ;;  %s31_s23 = int_to_ptr.vmem [resolvable:$true] %s30_s23 }
   0x9   :  { %36 = dma.hbm_to_vmem [thread:$0]  %s29_s19, 2048, %s31_s23, [#allocation6], %s257_s20, %s257_s20, %s258_s21  }
   0xa   :  { %250 = dma.done.wait [#allocation3], 512  }
   0xb   :  { %251 = vsyncadd [#allocation3], 4294966784 }
   0xc   :  { %252 = dma.done.wait [#allocation6], 2048  }
   0xd   :  { %253 = vsyncadd [#allocation6], 4294965248  ;;  %v66_v0 = vld [vmem:[#allocation5 + $0x78] sm:$0xff]  ;;  %v65_v1 = vld [vmem:[#allocation5 + $0x70] sm:$0xff] }
   0xe   :  { %125 = vmatpush.msra.mxu2 %v66_v0  ;;  %126 = vmatpush.msra.mxu3 %v66_v0  ;;  %v64_v2 = vld [vmem:[#allocation5 + $0x68] sm:$0xff]  ;;  %v63_v3 = vld [vmem:[#allocation5 + $0x60] sm:$0xff]  ;;  %v62_v4 = vld [vmem:[#allocation5 + $0x58] sm:$0xff] }
   0xf   :  { %71 = vmatpush.msra.mxu0 %v66_v0  ;;  %124 = vmatpush.msra.mxu1 %v66_v0  ;;  %v61_v5 = vld [vmem:[#allocation5 + $0x50] sm:$0xff]  ;;  %v60_v6 = vld [vmem:[#allocation5 + $0x48] sm:$0xff]  ;;  %v59_v7 = vld [vmem:[#allocation5 + $0x40] sm:$0xff] }
  0x10   :  { %128 = vmatpush.msra.mxu2 %v65_v1  ;;  %129 = vmatpush.msra.mxu3 %v65_v1  ;;  %v58_v8 = vld [vmem:[#allocation5 + $0x38] sm:$0xff]  ;;  %v57_v9 = vld [vmem:[#allocation5 + $0x30] sm:$0xff]  ;;  %v56_v10 = vld [vmem:[#allocation5 + $0x28] sm:$0xff] }
  0x11   :  { %72 = vmatpush.msra.mxu0 %v65_v1  ;;  %127 = vmatpush.msra.mxu1 %v65_v1  ;;  %v55_v11 = vld [vmem:[#allocation5 + $0x20] sm:$0xff]  ;;  %v54_v12 = vld [vmem:[#allocation5 + $0x18] sm:$0xff]  ;;  %v53_v13 = vld [vmem:[#allocation5 + $0x10] sm:$0xff] }
  0x12   :  { %131 = vmatpush.msra.mxu2 %v64_v2  ;;  %132 = vmatpush.msra.mxu3 %v64_v2  ;;  %v52_v14 = vld [vmem:[#allocation5 + $0x8] sm:$0xff]  ;;  %v51_v15 = vld [vmem:[#allocation5] sm:$0xff]  ;;  %v49_v16 = vld [vmem:[#allocation2 + $0x10] sm:$0xff] }
  0x13   :  { %73 = vmatpush.msra.mxu0 %v64_v2  ;;  %130 = vmatpush.msra.mxu1 %v64_v2  ;;  %v50_v17 = vld [vmem:[#allocation2 + $0x18] sm:$0xff]  ;;  %v47_v18 = vld [vmem:[#allocation2] sm:$0xff]  ;;  %v48_v19 = vld [vmem:[#allocation2 + $0x8] sm:$0xff] }
  0x14   :  { %134 = vmatpush.msra.mxu2 %v63_v3  ;;  %135 = vmatpush.msra.mxu3 %v63_v3  ;;  %v177_v20 = vld [vmem:[%s304_s2] ss:$0 sm:$0xff] }
  0x15   :  { %74 = vmatpush.msra.mxu0 %v63_v3  ;;  %133 = vmatpush.msra.mxu1 %v63_v3 }
  0x16   :  { %137 = vmatpush.msra.mxu2 %v62_v4  ;;  %138 = vmatpush.msra.mxu3 %v62_v4 }
  0x17   :  { %75 = vmatpush.msra.mxu0 %v62_v4  ;;  %136 = vmatpush.msra.mxu1 %v62_v4 }
  0x18   :  { %140 = vmatpush.msra.mxu2 %v61_v5  ;;  %141 = vmatpush.msra.mxu3 %v61_v5 }
  0x19   :  { %76 = vmatpush.msra.mxu0 %v61_v5  ;;  %139 = vmatpush.msra.mxu1 %v61_v5 }
  0x1a   :  { %143 = vmatpush.msra.mxu2 %v60_v6  ;;  %144 = vmatpush.msra.mxu3 %v60_v6 }
  0x1b   :  { %77 = vmatpush.msra.mxu0 %v60_v6  ;;  %142 = vmatpush.msra.mxu1 %v60_v6 }
  0x1c   :  { %146 = vmatpush.msra.mxu2 %v59_v7  ;;  %147 = vmatpush.msra.mxu3 %v59_v7 }
  0x1d   :  { %78 = vmatpush.msra.mxu0 %v59_v7  ;;  %145 = vmatpush.msra.mxu1 %v59_v7 }
  0x1e   :  { %149 = vmatpush.msra.mxu2 %v58_v8  ;;  %150 = vmatpush.msra.mxu3 %v58_v8 }
  0x1f   :  { %79 = vmatpush.msra.mxu0 %v58_v8  ;;  %148 = vmatpush.msra.mxu1 %v58_v8 }
  0x20   :  { %152 = vmatpush.msra.mxu2 %v57_v9  ;;  %153 = vmatpush.msra.mxu3 %v57_v9 }
  0x21   :  { %80 = vmatpush.msra.mxu0 %v57_v9  ;;  %151 = vmatpush.msra.mxu1 %v57_v9 }
  0x22   :  { %155 = vmatpush.msra.mxu2 %v56_v10  ;;  %156 = vmatpush.msra.mxu3 %v56_v10 }
  0x23   :  { %81 = vmatpush.msra.mxu0 %v56_v10  ;;  %154 = vmatpush.msra.mxu1 %v56_v10 }
  0x24   :  { %158 = vmatpush.msra.mxu2 %v55_v11  ;;  %159 = vmatpush.msra.mxu3 %v55_v11 }
  0x25   :  { %82 = vmatpush.msra.mxu0 %v55_v11  ;;  %157 = vmatpush.msra.mxu1 %v55_v11 }
  0x26   :  { %161 = vmatpush.msra.mxu2 %v54_v12  ;;  %162 = vmatpush.msra.mxu3 %v54_v12 }
  0x27   :  { %83 = vmatpush.msra.mxu0 %v54_v12  ;;  %160 = vmatpush.msra.mxu1 %v54_v12 }
  0x28   :  { %164 = vmatpush.msra.mxu2 %v53_v13  ;;  %165 = vmatpush.msra.mxu3 %v53_v13 }
  0x29   :  { %84 = vmatpush.msra.mxu0 %v53_v13  ;;  %163 = vmatpush.msra.mxu1 %v53_v13 }
  0x2a   :  { %167 = vmatpush.msra.mxu2 %v52_v14  ;;  %168 = vmatpush.msra.mxu3 %v52_v14 }
  0x2b   :  { %85 = vmatpush.msra.mxu0 %v52_v14  ;;  %166 = vmatpush.msra.mxu1 %v52_v14 }
  0x2c   :  { %170 = vmatpush.msra.mxu2 %v51_v15  ;;  %171 = vmatpush.msra.mxu3 %v51_v15 }
  0x2d   :  { %93 = vmatmul.f32.vlgmr.msra.gmra.mxu2 %v49_v16  ;;  %96 = vmatmul.f32.vlgmr.msra.gmra.mxu3 %v50_v17 }
  0x2e   :  { %86 = vmatpush.msra.mxu0 %v51_v15  ;;  %169 = vmatpush.msra.mxu1 %v51_v15 }
  0x2f   :  { %87 = vmatmul.f32.vlgmr.msra.gmra.mxu0 %v47_v18  ;;  %90 = vmatmul.f32.vlgmr.msra.gmra.mxu1 %v48_v19 }
  0xac   :  { %v88_v21 = vpop.f32.mrf.mxu0  ;;  %v91_v22 = vpop.f32.mrf.mxu1 }
  0xad   :  { %v89_v23 = vadd.f32 %v177_v20, %v88_v21  ;;  %v92_v24 = vadd.f32 %v177_v20, %v91_v22 }
  0xaf   :  { %100 = vst [vmem:[#allocation7] sm:$0xff] %v89_v23 }
  0xb0   :  { %101 = vst [vmem:[#allocation7 + $0x8] sm:$0xff] %v92_v24  ;;  %v94_v25 = vpop.f32.mrf.mxu2  ;;  %v97_v26 = vpop.f32.mrf.mxu3 }
  0xb1   :  { %v95_v27 = vadd.f32 %v177_v20, %v94_v25  ;;  %v98_v28 = vadd.f32 %v177_v20, %v97_v26 }
  0xb3   :  { %102 = vst [vmem:[#allocation7 + $0x10] sm:$0xff] %v95_v27 }
  0xb4   :  { %103 = vst [vmem:[#allocation7 + $0x18] sm:$0xff] %v98_v28 }
  0xb5   :  { %107 = vsyncadd [#allocation4], 256  ;;  %s110_s26 = sshll.u32 %s305_s3, 4  ;;  %s260_s27 = smov [#allocation7]   ;;  %s111_s26 = int_to_ptr.hbm [resolvable:$true] %s110_s26 }
  0xb6   :  { %s108_s28 = sshll.u32 %s260_s27, 4  ;;  %s109_s28 = int_to_ptr.vmem [resolvable:$true] %s108_s28 }
  0xb7   :  { %116 = dma.vmem_to_hbm [thread:$0]  %s109_s28, 256, %s111_s26, [#allocation4], %s257_s20, %s257_s20, %s258_s21  }
  0xb8   :  { %254 = dma.done.wait [#allocation4], 512  }
  0xb9   :  { %255 = vsyncadd [#allocation4], 4294966784 }
  0xba   :  { %121 = vsyncpa [#allocation3], 1 }
  0xbb   :  { %122 = vsyncpa [#allocation6], 1 }
  0xbc   :  { %123 = vsyncpa [#allocation4], 1 }

</bundles_post_ra>
